<compile_context>
chip_gen: v7x
topology: tpu7x:2x2x1
jax: 0.10.0
libtpu: 0.0.40
codegen_flags: <defaults>
</compile_context>

<pallas_src>
import functools

import jax
import jax.numpy as jnp
from jax.experimental import pallas as pl
from jax.experimental.pallas import tpu as pltpu


def _round_up(v, m):
    return ((v + m - 1) // m) * m


def _pick_tiles(M, N, K, dtype, tm, tn, tk):
    """Clamp tile sizes to the (padded) problem; keep lane dims 128-aligned
    and the sublane (M) dim aligned to the dtype tile."""
    sub = max(8, 32 // jnp.dtype(dtype).itemsize)
    tm = min(tm, _round_up(M, sub))
    tn = min(tn, _round_up(N, 128))
    tk = min(tk, _round_up(K, 128))
    return tm, tn, tk


def _lora_linear_kernel(x_ref, wt_ref, xa_ref, bt_ref, bias_ref, o_ref, acc_ref):
    """One (tm, tn) output tile, accumulating the base matmul over the K axis.

    x_ref    : (tm, tk)  input slice
    wt_ref   : (tk, tn)  frozen weight, pre-transposed to (K, N)
    xa_ref   : (tm, R)   precomputed, pre-scaled x @ A.T  (depends on i only)
    bt_ref   : (R,  tn)  LoRA up-projection, pre-transposed to (R, N)
    bias_ref : (1,  tn)
    o_ref    : (tm, tn)
    acc_ref  : (tm, tn) f32 scratch accumulator
    """
    k = pl.program_id(2)
    nk = pl.num_programs(2)

    @pl.when(k == 0)
    def _init():
        acc_ref[...] = jnp.zeros_like(acc_ref)

    # Base path: canonical MXU orientation, contract K with K.
    acc_ref[...] += jnp.dot(x_ref[...], wt_ref[...],
                            preferred_element_type=jnp.float32)

    @pl.when(k == nk - 1)
    def _finalize():
        # One rank-R up-projection + bias per output tile (out of the K loop).
        lora = jnp.dot(xa_ref[...], bt_ref[...],
                       preferred_element_type=jnp.float32)
        out = acc_ref[...] + lora + bias_ref[...].astype(jnp.float32)
        o_ref[...] = out.astype(o_ref.dtype)


def lora_prepare(weight, bias, A, B, scaling, *, tn, tk):
    """One-time (weight-load time) preparation of the frozen parameters.

    Pads and pre-transposes W/B/bias to tile multiples so the per-call path
    never touches them again.  Returns a dict of device arrays.
    """
    N, K = weight.shape
    Np, Kp = _round_up(N, tn), _round_up(K, tk)

    wt = weight.T                                   # (K, N) canonical layout
    if (Kp, Np) != (K, N):
        wt = jnp.pad(wt, ((0, Kp - K), (0, Np - N)))

    bt = B.T                                        # (R, N)
    if Np != N:
        bt = jnp.pad(bt, ((0, 0), (0, Np - N)))

    if bias is None:
        bias = jnp.zeros((N,), dtype=weight.dtype)
    bias2d = jnp.pad(bias, (0, Np - N)).reshape(1, Np) if Np != N else bias.reshape(1, N)

    a_scaled = (A * jnp.asarray(scaling, A.dtype))  # fold alpha/r into A

    return dict(wt=wt, bt=bt, bias2d=bias2d, a_scaled=a_scaled)


@functools.partial(jax.jit, static_argnames=("n_out", "tm", "tn", "tk"))
def lora_apply(x, wt, bt, bias2d, a_scaled, *, n_out, tm, tn, tk):
    """Per-call path: pads only activations, runs the Pallas kernel."""
    M, K = x.shape
    Kp, Np = wt.shape
    R = a_scaled.shape[0]
    Mp = _round_up(M, tm)

    # Tiny (M, R) LoRA down-projection, already scaled (plain XLA matmul).
    xa = jnp.dot(x, a_scaled.T).astype(x.dtype)

    x_p = x
    if (Mp, Kp) != (M, K):
        x_p = jnp.pad(x, ((0, Mp - M), (0, Kp - K)))
    xa_p = jnp.pad(xa, ((0, Mp - M), (0, 0))) if Mp != M else xa

    grid = (Mp // tm, Np // tn, Kp // tk)

    out = pl.pallas_call(
        _lora_linear_kernel,
        out_shape=jax.ShapeDtypeStruct((Mp, Np), x.dtype),
        grid_spec=pltpu.PrefetchScalarGridSpec(
            num_scalar_prefetch=0,
            grid=grid,
            in_specs=[
                pl.BlockSpec((tm, tk), lambda i, j, k: (i, k)),   # x tile
                pl.BlockSpec((tk, tn), lambda i, j, k: (k, j)),   # W.T tile
                pl.BlockSpec((tm, R), lambda i, j, k: (i, 0)),    # xa tile
                pl.BlockSpec((R, tn), lambda i, j, k: (0, j)),    # B.T tile
                pl.BlockSpec((1, tn), lambda i, j, k: (0, j)),    # bias tile
            ],
            out_specs=pl.BlockSpec((tm, tn), lambda i, j, k: (i, j)),
            scratch_shapes=[
                pltpu.VMEM((tm, tn), jnp.float32),   # base accumulator
            ],
        ),
        compiler_params=pltpu.CompilerParams(
            dimension_semantics=("parallel", "parallel", "arbitrary"),
            vmem_limit_bytes=48 * 1024 * 1024,   # safe on v7x's 64 MiB VMEM
        ),
    )(x_p, wt, xa_p, bt, bias2d)

    return out[:M, :n_out]


def lora_linear(x, weight, bias, A, B, scaling, *, tm=256, tn=512, tk=1024):
    """Convenience one-shot wrapper.  In real use, call lora_prepare once at
    weight-load time and lora_apply per forward."""
    M, K = x.shape
    N = weight.shape[0]
    tm, tn, tk = _pick_tiles(M, N, K, x.dtype, tm, tn, tk)
    prep = lora_prepare(weight, bias, A, B, scaling, tn=tn, tk=tk)
    return lora_apply(x, prep["wt"], prep["bt"], prep["bias2d"], prep["a_scaled"],
                      n_out=N, tm=tm, tn=tn, tk=tk)


def lora_linear_ref(x, weight, bias, A, B, scaling):
    base = x @ weight.T + (0.0 if bias is None else bias[None, :])
    lora = (x @ (B @ A).T) * scaling
    return base + lora


if __name__ == "__main__":
    key = jax.random.PRNGKey(0)
    k1, k2, k3, k4, k5, k6, k7 = jax.random.split(key, 7)

    # ---- Test 1: module-like small shapes (single grid step per axis) ----
    batch, in_features, out_features, r, alpha = 8, 32, 64, 4, 1.0
    scaling = alpha / r

    x = jax.random.normal(k1, (batch, in_features), dtype=jnp.float32)
    xavier_std = (2.0 / (in_features + out_features)) ** 0.5
    weight = jax.random.normal(k2, (out_features, in_features), jnp.float32) * xavier_std
    bias = jnp.zeros((out_features,), dtype=jnp.float32)
    A = jax.random.normal(k3, (r, in_features), dtype=jnp.float32) * 0.01
    # Module init has B = 0 (LoRA path inert); use a small nonzero B so the
    # low-rank path is actually exercised.
    B = jnp.full((out_features, r), 0.05, dtype=jnp.float32)

    out = jax.block_until_ready(lora_linear(x, weight, bias, A, B, scaling=scaling))
    ref = lora_linear_ref(x, weight, bias, A, B, scaling)
    assert out.shape == (batch, out_features)
    assert jnp.allclose(out, ref, atol=1e-4, rtol=1e-4), "test1 mismatch vs reference"

    # ---- Test 2: multi-tile grid (exercises M/N tiling + K accumulation) ----
    b2, in2, out2, r2, alpha2 = 32, 256, 256, 8, 2.0
    scaling2 = alpha2 / r2
    x2 = jax.random.normal(k4, (b2, in2), dtype=jnp.float32)
    std2 = (2.0 / (in2 + out2)) ** 0.5
    w2 = jax.random.normal(k5, (out2, in2), dtype=jnp.float32) * std2
    bias2 = jax.random.normal(k6, (out2,), dtype=jnp.float32) * 0.1
    A2 = jax.random.normal(k7, (r2, in2), dtype=jnp.float32) * 0.01
    B2 = jnp.full((out2, r2), 0.03, dtype=jnp.float32)

    out2_k = jax.block_until_ready(
        lora_linear(x2, w2, bias2, A2, B2, scaling=scaling2, tm=16, tn=128, tk=128))
    ref2 = lora_linear_ref(x2, w2, bias2, A2, B2, scaling2)
    assert out2_k.shape == (b2, out2)
    assert jnp.allclose(out2_k, ref2, atol=1e-3, rtol=1e-3), "test2 mismatch vs reference"

    print("KERNEL_OK")
</pallas_src>

<mosaic_0001>
module attributes {stable_mosaic.version = 11 : i64} {
  func.func @_lora_linear_kernel(%arg0: i32, %arg1: i32, %arg2: i32, %arg3: memref<8x128xf32, #tpu.memory_space<vmem>>, %arg4: memref<128x128xf32, #tpu.memory_space<vmem>>, %arg5: memref<8x4xf32, #tpu.memory_space<vmem>>, %arg6: memref<4x128xf32, #tpu.memory_space<vmem>>, %arg7: memref<1x128xf32, #tpu.memory_space<vmem>>, %arg8: memref<8x128xf32, #tpu.memory_space<vmem>>, %arg9: memref<8x128xf32, #tpu.memory_space<vmem>>) attributes {dimension_semantics = [#tpu.dimension_semantics<parallel>, #tpu.dimension_semantics<parallel>, #tpu.dimension_semantics<arbitrary>], iteration_bounds = array<i64: 1, 1, 1>, scalar_prefetch = 0 : i64, scratch_operands = 1 : i64, tpu.core_type = #tpu.core_type<tc>, window_params = [{transform_indices = @transform_0, window_bounds = array<i64: 8, 128>}, {transform_indices = @transform_1, window_bounds = array<i64: 128, 128>}, {transform_indices = @transform_2, window_bounds = array<i64: 8, 4>}, {transform_indices = @transform_3, window_bounds = array<i64: 4, 128>}, {transform_indices = @transform_4, window_bounds = array<i64: 1, 128>}, {transform_indices = @transform_5, window_bounds = array<i64: 8, 128>}]} {
    %c0_i32 = arith.constant 0 : i32
    %0 = arith.cmpi eq, %arg2, %c0_i32 : i32
    %1 = arith.extui %0 : i1 to i32
    %c0_i32_0 = arith.constant 0 : i32
    %2 = arith.cmpi ne, %1, %c0_i32_0 : i32
    scf.if %2 {
      %cst_10 = arith.constant 0.000000e+00 : f32
      %12 = vector.broadcast %cst_10 : f32 to vector<8x128xf32>
      %c0_11 = arith.constant 0 : index
      %c0_12 = arith.constant 0 : index
      %13 = vector.load %arg9[%c0_11, %c0_12] : memref<8x128xf32, #tpu.memory_space<vmem>>, vector<8x128xf32>
      tpu.vector_store %arg9[%c0_11, %c0_12], %12 {strides = array<i32>} : memref<8x128xf32, #tpu.memory_space<vmem>>, vector<8x128xf32>,
    } else {
    }
    %c0 = arith.constant 0 : index
    %c0_1 = arith.constant 0 : index
    %3 = vector.load %arg9[%c0, %c0_1] : memref<8x128xf32, #tpu.memory_space<vmem>>, vector<8x128xf32>
    %c0_2 = arith.constant 0 : index
    %c0_3 = arith.constant 0 : index
    %4 = vector.load %arg3[%c0_2, %c0_3] : memref<8x128xf32, #tpu.memory_space<vmem>>, vector<8x128xf32>
    %c0_4 = arith.constant 0 : index
    %c0_5 = arith.constant 0 : index
    %5 = vector.load %arg4[%c0_4, %c0_5] : memref<128x128xf32, #tpu.memory_space<vmem>>, vector<128x128xf32>
    %cst = arith.constant dense<0.000000e+00> : vector<8x128xf32>
    %6 = tpu.matmul %4, %5, %cst {dimension_numbers = #tpu.dot_dimension_numbers<[1], [0], [0], [1], [0, 0, 1, 1], [], []>} : vector<8x128xf32>, vector<128x128xf32>, vector<8x128xf32> -> vector<8x128xf32>
    %7 = arith.addf %3, %6 : vector<8x128xf32>
    %c0_6 = arith.constant 0 : index
    %c0_7 = arith.constant 0 : index
    %8 = vector.load %arg9[%c0_6, %c0_7] : memref<8x128xf32, #tpu.memory_space<vmem>>, vector<8x128xf32>
    tpu.vector_store %arg9[%c0_6, %c0_7], %7 {strides = array<i32>} : memref<8x128xf32, #tpu.memory_space<vmem>>, vector<8x128xf32>,
    %c0_i32_8 = arith.constant 0 : i32
    %9 = arith.cmpi eq, %arg2, %c0_i32_8 : i32
    %10 = arith.extui %9 : i1 to i32
    %c0_i32_9 = arith.constant 0 : i32
    %11 = arith.cmpi ne, %10, %c0_i32_9 : i32
    scf.if %11 {
      %c0_10 = arith.constant 0 : index
      %c0_11 = arith.constant 0 : index
      %12 = vector.load %arg5[%c0_10, %c0_11] : memref<8x4xf32, #tpu.memory_space<vmem>>, vector<8x4xf32>
      %c0_12 = arith.constant 0 : index
      %c0_13 = arith.constant 0 : index
      %13 = vector.load %arg6[%c0_12, %c0_13] : memref<4x128xf32, #tpu.memory_space<vmem>>, vector<4x128xf32>
      %cst_14 = arith.constant dense<0.000000e+00> : vector<8x128xf32>
      %14 = tpu.matmul %12, %13, %cst_14 {dimension_numbers = #tpu.dot_dimension_numbers<[1], [0], [0], [1], [0, 0, 1, 1], [], []>} : vector<8x4xf32>, vector<4x128xf32>, vector<8x128xf32> -> vector<8x128xf32>
      %c0_15 = arith.constant 0 : index
      %c0_16 = arith.constant 0 : index
      %15 = vector.load %arg9[%c0_15, %c0_16] : memref<8x128xf32, #tpu.memory_space<vmem>>, vector<8x128xf32>
      %16 = arith.addf %15, %14 : vector<8x128xf32>
      %c0_17 = arith.constant 0 : index
      %c0_18 = arith.constant 0 : index
      %17 = vector.load %arg7[%c0_17, %c0_18] : memref<1x128xf32, #tpu.memory_space<vmem>>, vector<1x128xf32>
      %18 = vector.broadcast %17 : vector<1x128xf32> to vector<8x128xf32>
      %19 = arith.addf %16, %18 : vector<8x128xf32>
      %c0_19 = arith.constant 0 : index
      %c0_20 = arith.constant 0 : index
      %20 = vector.load %arg8[%c0_19, %c0_20] : memref<8x128xf32, #tpu.memory_space<vmem>>, vector<8x128xf32>
      tpu.vector_store %arg8[%c0_19, %c0_20], %19 {strides = array<i32>} : memref<8x128xf32, #tpu.memory_space<vmem>>, vector<8x128xf32>,
    } else {
    }
    return
  }
  func.func @transform_0(%arg0: i32, %arg1: i32, %arg2: i32) -> (i32, i32) {
    %c0_i32 = arith.constant 0 : i32
    return %arg0, %arg2 : i32, i32
  }
  func.func @transform_1(%arg0: i32, %arg1: i32, %arg2: i32) -> (i32, i32) {
    %c0_i32 = arith.constant 0 : i32
    return %arg2, %arg1 : i32, i32
  }
  func.func @transform_2(%arg0: i32, %arg1: i32, %arg2: i32) -> (i32, i32) {
    %c0_i32 = arith.constant 0 : i32
    %c0_i32_0 = arith.constant 0 : i32
    return %arg0, %c0_i32 : i32, i32
  }
  func.func @transform_3(%arg0: i32, %arg1: i32, %arg2: i32) -> (i32, i32) {
    %c0_i32 = arith.constant 0 : i32
    %c0_i32_0 = arith.constant 0 : i32
    return %c0_i32, %arg1 : i32, i32
  }
  func.func @transform_4(%arg0: i32, %arg1: i32, %arg2: i32) -> (i32, i32) {
    %c0_i32 = arith.constant 0 : i32
    %c0_i32_0 = arith.constant 0 : i32
    return %c0_i32, %arg1 : i32, i32
  }
  func.func @transform_5(%arg0: i32, %arg1: i32, %arg2: i32) -> (i32, i32) {
    %c0_i32 = arith.constant 0 : i32
    return %arg0, %arg1 : i32, i32
  }
}

</mosaic_0001>

<bundles_post_ra>
// kernel: lora_apply.1
= control target key start
LH: loop header
LB: loop body
LE: loop exit
PB: predicated region body
PF: predicated region fallthrough
CT: control target
= control target key end

     0   :  { %10 = vsyncpa [#allocation4], 0  ;;  %s453_s0 = inlined_call_operand.vmem [shape: f32[8,128], index: 0, kind: input, shape index: {}]   ;;  %s454_s1 = inlined_call_operand.hbm [shape: f32[128,128], index: 1, kind: input, shape index: {}]   ;;  %s455_s2 = inlined_call_operand.vmem [shape: f32[8,4], index: 2, kind: input, shape index: {}]   ;;  %s456_s3 = inlined_call_operand.vmem [shape: f32[4,128], index: 3, kind: input, shape index: {}]   ;;  %s457_s4 = inlined_call_operand.vmem [shape: f32[1,128], index: 4, kind: input, shape index: {}]   ;;  %s458_s5 = inlined_call_operand.hbm [shape: f32[8,128], index: 5, kind: output, shape index: {}]  }
   0x1   :  { %11 = vsyncpa [#allocation5], 0  ;;  %s380_s18 = smov [#allocation3]   ;;  %s332_s22 = scalar_lea.hbm %s454_s1, 2048 }
   0x2   :  { %s19_s19 = sshll.u32 %s380_s18, 4  ;;  %p333_p0 = scmp.ne.s32.totalorder %s454_s1, %s332_s22  ;;  %s20_s19 = int_to_ptr.vmem [resolvable:$true] %s19_s19 }
   0x3   :  { %p336_p1 = scmp.lt.u32.totalorder %s332_s22, %s454_s1 }
   0x5   :  { %p338_p2 = pnand %p336_p1, %p333_p0 }
   0x7   :  { %341 = shalt.err (!%p338_p2)
}
   0x8   :  { %s342_s27 = scalar_lea.vmem %s20_s19, 2048  ;;  %p347_p4 = scmp.lt.s32.totalorder %s20_s19, %s20_s19 }
   0x9   :  { %p343_p3 = scmp.ne.s32.totalorder %s20_s19, %s342_s27  ;;  %p348_p5 = scmp.lt.s32.totalorder %s342_s27, %s342_s27 }
   0xb   :  { %p349_p6 = por %p348_p5, %p347_p4 }
   0xd   :  { %p350_p7 = pnand %p349_p6, %p343_p3 }
   0xf   :  { %353 = shalt.err (!%p350_p7)
}
  0x10   :  { %s381_s28 = smov 128   ;;  %s382_s29 = smov 8  }
  0x11   :  { %25 = dma.hbm_to_vmem [thread:$0]  %s454_s1, 2048, %s20_s19, [#allocation4], %s381_s28, %s381_s28, %s382_s29  }
  0x12   :  { %376 = dma.done.wait [#allocation4], 2048  }
  0x13   :  { %377 = vsyncadd [#allocation4], 4294965248  ;;  %v383_v0 = vmov 0.0|0.0   ;;  %v384_v1 = vmov 0.0   ;;  %vm385_vm0 = vmmov 0   ;;  %v42_v2 = vld [vmem:[#allocation3] sm:$0xff] }
  0x14   :  { %301 = vmatprep.subr.bf16.mxu0 %v383_v0  ;;  %296 = vmatprep.subr.mxu1 %v384_v1  ;;  %v43_v3 = vld [vmem:[#allocation3 + $0x8] sm:$0xff]  ;;  %v44_v4 = vld [vmem:[#allocation3 + $0x10] sm:$0xff]  ;;  %v45_v6 = vld [vmem:[#allocation3 + $0x18] sm:$0xff]  ;;  %vm139_vm1 = vcmask 1043456   ;;  %vm135_vm2 = vcmask 31744   ;;  %s386_s12 = smov [#allocation6]  }
  0x15   :  { %298 = vmatprep.mubr.msk.f32.mxu1 %vm385_vm0, %v384_v1  ;;  %293 = vmatprep.mubr.msk.f32.mxu0 %vm385_vm0, %v384_v1  ;;  %v302_v5 = vpack.c.bf16 %v43_v3, %v42_v2  ;;  %v305_v7 = vpack.c.bf16 %v45_v6, %v44_v4  ;;  %v46_v8 = vld [vmem:[#allocation3 + $0x20] sm:$0xff]  ;;  %v47_v9 = vld [vmem:[#allocation3 + $0x28] sm:$0xff]  ;;  %v48_v13 = vld [vmem:[#allocation3 + $0x30] sm:$0xff]  ;;  %s230_s13 = sshll.u32 %s386_s12, 4  ;;  %s231_s13 = int_to_ptr.vmem [resolvable:$true] %s230_s13 }
  0x16   :  { %v134_v10 = vld [vmem:[%s456_s3] sm:$0xf]  ;;  %v308_v12 = vpack.c.bf16 %v47_v9, %v46_v8  ;;  %v49_v14 = vld [vmem:[#allocation3 + $0x38] sm:$0xff]  ;;  %v51_v17 = vld [vmem:[#allocation3 + $0x48] sm:$0xff]  ;;  %s354_s14 = scalar_lea.vmem %s231_s13, 128  ;;  %p359_p9 = scmp.lt.s32.totalorder %s231_s13, %s231_s13 }
  0x17   :  { %303 = vmatpush3.bf16.msra.mxu0 %v302_v5  ;;  %v133_v11 = vld [vmem:[%s455_s2] sm:$0xff]  ;;  %297 = vmatpush3.msk.msra.mxu1 %vm139_vm1, %v134_v10  ;;  %v311_v15 = vpack.c.bf16 %v49_v14, %v48_v13  ;;  %v52_v19 = vld [vmem:[#allocation3 + $0x50] sm:$0xff]  ;;  %v53_v20 = vld [vmem:[#allocation3 + $0x58] sm:$0xff]  ;;  %p355_p8 = scmp.ne.s32.totalorder %s231_s13, %s354_s14  ;;  %p360_p10 = scmp.lt.s32.totalorder %s354_s14, %s354_s14 }
  0x18   :  { %304 = vmatprep.subr.bf16.mxu0 %v383_v0  ;;  %299 = vmatmul.mubr.msk.f32.vlgmr.msra.gmra.mrb[0].mxu1 %vm135_vm2, %v133_v11  ;;  %v50_v16 = vld [vmem:[#allocation3 + $0x40] sm:$0xff]  ;;  %v317_v21 = vpack.c.bf16 %v53_v20, %v52_v19  ;;  %v55_v23 = vld [vmem:[#allocation3 + $0x68] sm:$0xff]  ;;  %v56_v25 = vld [vmem:[#allocation3 + $0x70] sm:$0xff] }
  0x19   :  { %v314_v18 = vpack.c.bf16 %v51_v17, %v50_v16  ;;  %v54_v22 = vld [vmem:[#allocation3 + $0x60] sm:$0xff]  ;;  %v57_v26 = vld [vmem:[#allocation3 + $0x78] sm:$0xff]  ;;  %p361_p11 = por %p360_p10, %p359_p9 }
  0x1a   :  { %v320_v24 = vpack.c.bf16 %v55_v23, %v54_v22  ;;  %v323_v27 = vpack.c.bf16 %v57_v26, %v56_v25  ;;  %v41_v28 = vld [vmem:[%s453_s0] sm:$0xff] }
  0x1b   :  { %306 = vmatpush3.bf16.msra.mxu0 %v305_v7  ;;  %v241_v32 = vld [vmem:[%s457_s4] ss:$0 sm:$0xff]  ;;  %p362_p12 = pnand %p361_p11, %p355_p8 }
  0x1c   :  { %307 = vmatprep.subr.bf16.mxu0 %v383_v0 }
  0x1f   :  { %309 = vmatpush3.bf16.msra.mxu0 %v308_v12 }
  0x20   :  { %310 = vmatprep.subr.bf16.mxu0 %v383_v0 }
  0x23   :  { %312 = vmatpush3.bf16.msra.mxu0 %v311_v15 }
  0x24   :  { %313 = vmatprep.subr.bf16.mxu0 %v383_v0 }
  0x27   :  { %315 = vmatpush3.bf16.msra.mxu0 %v314_v18 }
  0x28   :  { %316 = vmatprep.subr.bf16.mxu0 %v383_v0 }
  0x2b   :  { %318 = vmatpush3.bf16.msra.mxu0 %v317_v21 }
  0x2c   :  { %319 = vmatprep.subr.bf16.mxu0 %v383_v0 }
  0x2f   :  { %321 = vmatpush3.bf16.msra.mxu0 %v320_v24 }
  0x30   :  { %322 = vmatprep.subr.bf16.mxu0 %v383_v0 }
  0x33   :  { %324 = vmatpush3.bf16.msra.mxu0 %v323_v27 }
  0x36   :  { %294 = vmatmul.mubr.f32.vlgmr.msra.gmra.mrb[0].mxu0 %v41_v28 }
  0xeb   :  { %v209_v29 = vpop.f32.mrb[0].mxu1 }
  0xec   :  { %v300_v30 = vpop.f32.mrb[1].mxu1 }
 0x109   :  { %v124_v31 = vpop.f32.mrb[0].mxu0 }
 0x10a   :  { %v214_v33 = vadd.f32 %v209_v29, %v124_v31  ;;  %v295_v34 = vpop.f32.mrb[1].mxu0 }
 0x10c   :  { %v222_v35 = vadd.f32 %v241_v32, %v214_v33 }
 0x10e   :  { %223 = vst [vmem:[#allocation6] sm:$0xff] %v222_v35 }
 0x10f   :  { %365 = shalt.err (!%p362_p12)
}
 0x110   :  { %s366_s16 = scalar_lea.hbm %s458_s5, 128 }
 0x111   :  { %p367_p13 = scmp.ne.s32.totalorder %s458_s5, %s366_s16  ;;  %p370_p0 = scmp.lt.u32.totalorder %s366_s16, %s458_s5 }
 0x113   :  { %p372_p1 = pnand %p370_p0, %p367_p13 }
 0x115   :  { %375 = shalt.err (!%p372_p1)
}
 0x116   :  { %233 = dma.vmem_to_hbm [thread:$0]  %s231_s13, 128, %s458_s5, [#allocation5]  }
 0x117   :  { %378 = dma.done.wait [#allocation5], 128  }
 0x118   :  { %379 = vsyncadd [#allocation5], 4294967168 }
 0x119   :  { %237 = vsyncpa [#allocation4], 1 }
 0x11a   :  { %238 = vsyncpa [#allocation5], 1 }

</bundles_post_ra>
